<compile_context>
chip_gen: v5e
topology: v5e:2x2
jax: 0.10.0
libtpu: 0.0.40
codegen_flags: <defaults>
</compile_context>

<pallas_src>
import functools

import jax
import jax.numpy as jnp
from jax import lax
from jax.experimental import pallas as pl
from jax.experimental.pallas import tpu as pltpu

LAMBDA_COEFF = 0.005
EPS = 1e-6


def _vmem_capacity_bytes():
    """Physical VMEM per core (v5e/v6e: 128 MiB, v7x: 64 MiB); safe fallback."""
    try:
        info = pltpu.get_tpu_info()
        cap = getattr(info, "vmem_capacity_bytes", None)
        if cap:
            return int(cap)
    except Exception:
        pass
    return 128 * 1024 * 1024


def _vmem_limit_bytes():
    """Generation-aware scoped-VMEM limit with headroom for compiler scratch."""
    cap = _vmem_capacity_bytes()
    # ~52 MiB on v7x (64 MiB physical), ~108 MiB on v5e/v6e (128 MiB physical).
    return max(32 << 20, min(int(cap * 0.85), cap - (12 << 20)))


def _pick_tile(n, candidates, max_tile=None):
    """Largest candidate that evenly divides n (and respects max_tile), else n."""
    for c in candidates:
        if (max_tile is None or c <= max_tile) and n >= c and n % c == 0:
            return c
    return n


def _normalize_kernel(z1_ref, z2_ref, z1s_ref, z2s_ref, diag_ref, *, inv_b, sqrt_inv_b):
    """Per-feature batch-norm of both views -> pre-scaled bf16 operands + f32 diag(c)."""
    z1 = z1_ref[...].astype(jnp.float32)
    z2 = z2_ref[...].astype(jnp.float32)

    z1c = z1 - jnp.mean(z1, axis=0, keepdims=True)
    z2c = z2 - jnp.mean(z2, axis=0, keepdims=True)
    # Biased variance (matches torch.var(dim=0, unbiased=False)); eps inside
    # the sqrt; rsqrt runs on the EUP slot.
    z1n = z1c * lax.rsqrt(jnp.mean(z1c * z1c, axis=0, keepdims=True) + EPS)
    z2n = z2c * lax.rsqrt(jnp.mean(z2c * z2c, axis=0, keepdims=True) + EPS)

    # diag(c)_j = (1/B) sum_b z1n[b, j] z2n[b, j] -- no matmul needed, kept f32.
    diag_ref[...] = jnp.sum(z1n * z2n, axis=0, keepdims=True) * inv_b

    # Pre-scale by sqrt(1/B) so phase 2 accumulates c directly:
    #   c = (z1n * s)^T @ (z2n * s),  s = sqrt(1/B).
    z1s_ref[...] = (z1n * sqrt_inv_b).astype(jnp.bfloat16)
    z2s_ref[...] = (z2n * sqrt_inv_b).astype(jnp.bfloat16)


def _xcorr_sumsq_kernel(z1s_ref, z2s_ref, out_ref, acc_ref):
    """Accumulate c_tile = z1s_tile^T @ z2s_tile over the batch; emit sum(c_tile^2)."""
    k = pl.program_id(2)

    @pl.when(k == 0)
    def _():
        acc_ref[...] = jnp.zeros_like(acc_ref)

    # Contract the batch axis directly (no .T); bf16 MXU operands, f32 accumulate.
    # TODO(synk): if pl.lower_as_mlir shows a per-step vxpose here, have phase 1
    # store z1s transposed (D, B) so this becomes a canonical (tn,tk)x(tk,tn) dot.
    acc_ref[...] += lax.dot_general(
        z1s_ref[...], z2s_ref[...],
        dimension_numbers=(((0,), (0,)), ((), ())),
        preferred_element_type=jnp.float32)

    @pl.when(k == pl.num_programs(2) - 1)
    def _():
        c_tile = acc_ref[...]
        out_ref[...] = jnp.sum(c_tile * c_tile, keepdims=True).reshape(1, 1, 1, 1)


def barlow_twins_loss(z1, z2, *, lambda_coeff=LAMBDA_COEFF):
    assert z1.ndim == 2 and z1.shape == z2.shape
    B, D = z1.shape
    inv_b = 1.0 / B
    vmem_limit = _vmem_limit_bytes()

    # TODO(synk): for production shapes where D (or B) is not a multiple of 128,
    # pad host-side (masking padded features) so blocks are lane-dense instead
    # of falling back to full-extent blocks.

    # ---------- Phase 1: normalize both views -> pre-scaled bf16 + f32 diag ----------
    # Block is (B, tf); per-step VMEM ~ 2*2*B*tf*4 (f32 inputs) + 2*2*B*tf*2
    # (bf16 outputs) = 24*B*tf bytes, so bound tf by B and the VMEM budget.
    # TODO(synk): for very large B (>~8K) tile the batch axis too, accumulating
    # sum / sum-of-squares across a batch grid (var = E[x^2] - E[x]^2).
    budget = vmem_limit // 2
    max_tf = max(128, budget // max(1, 24 * B))
    tf = _pick_tile(D, (1024, 512, 256, 128), max_tile=max_tf)
    nf = pl.cdiv(D, tf)

    z1s, z2s, diag = pl.pallas_call(
        functools.partial(_normalize_kernel, inv_b=inv_b,
                          sqrt_inv_b=float(inv_b) ** 0.5),
        out_shape=(jax.ShapeDtypeStruct((B, D), jnp.bfloat16),
                   jax.ShapeDtypeStruct((B, D), jnp.bfloat16),
                   jax.ShapeDtypeStruct((1, D), jnp.float32)),
        grid=(nf,),
        in_specs=[pl.BlockSpec((B, tf), lambda f: (0, f)),
                  pl.BlockSpec((B, tf), lambda f: (0, f))],
        out_specs=(pl.BlockSpec((B, tf), lambda f: (0, f)),
                   pl.BlockSpec((B, tf), lambda f: (0, f)),
                   pl.BlockSpec((1, tf), lambda f: (0, f))),
        compiler_params=pltpu.CompilerParams(
            dimension_semantics=("parallel",),
            vmem_limit_bytes=vmem_limit),
    )(z1, z2)

    # ---------- Phase 2: lambda^2 * sum(c^2) via a tiled (i, j, k) MXU grid ----------
    # VMEM per step ~ acc tn^2*4 + 2 inputs * 2 buffers * tk*tn*2 bytes.
    tk = _pick_tile(B, (512, 256, 128))

    def _phase2_fits(tn):
        return tn * tn * 4 + 2 * 2 * tk * tn * 2 <= vmem_limit // 2

    tn = D
    for cand in (1024, 512, 256, 128):
        if D % cand == 0 and _phase2_fits(cand):
            tn = cand
            break
    ni = pl.cdiv(D, tn)
    nk = pl.cdiv(B, tk)

    # TODO(synk): when B << D and phase 2 is MXU-bound, switch to the Gram-matrix
    # form ||Z1n^T Z2n||_F^2 = <Z1n Z1n^T, Z2n Z2n^T>_F (2*D*B^2 MACs vs D^2*B).
    partials = pl.pallas_call(
        _xcorr_sumsq_kernel,
        out_shape=jax.ShapeDtypeStruct((ni, ni, 1, 1), jnp.float32),
        grid=(ni, ni, nk),
        in_specs=[
            pl.BlockSpec((tk, tn), lambda i, j, k: (k, i)),   # z1s column tile
            pl.BlockSpec((tk, tn), lambda i, j, k: (k, j)),   # z2s column tile
        ],
        out_specs=pl.BlockSpec((1, 1, 1, 1), lambda i, j, k: (i, j, 0, 0)),
        scratch_shapes=[pltpu.VMEM((tn, tn), jnp.float32)],
        compiler_params=pltpu.CompilerParams(
            # On v7x, i/j "parallel" should shard across the two TensorCores.
            dimension_semantics=("parallel", "parallel", "arbitrary"),
            vmem_limit_bytes=vmem_limit),
    )(z1s, z2s)

    # Tiny scalar epilogue (ni*ni + D elements) outside the kernels.
    lam2 = jnp.float32(lambda_coeff) ** 2
    on_diag_corr = jnp.sum((diag - 1.0) ** 2 - lam2 * diag * diag)
    return lam2 * jnp.sum(partials) + on_diag_corr


def _reference(z1, z2, lambda_coeff=LAMBDA_COEFF):
    # Pure-JAX reference matching the PyTorch module (biased variance).
    z1 = z1 - z1.mean(axis=0)
    z2 = z2 - z2.mean(axis=0)
    std1 = jnp.sqrt(z1.var(axis=0) + EPS)
    std2 = jnp.sqrt(z2.var(axis=0) + EPS)
    z1 = z1 / std1
    z2 = z2 / std2
    b, d = z1.shape
    c = (z1.T @ z2) / b
    eye = jnp.eye(d, dtype=c.dtype)
    c_diff = c - eye
    c_diff = jnp.where(eye > 0, c_diff, lambda_coeff * c_diff)
    return jnp.sum(c_diff ** 2)


if __name__ == "__main__":
    key = jax.random.PRNGKey(0)
    k1, k2 = jax.random.split(key)
    B, D = 8, 32  # small projection-head shapes for the smoke test
    z1 = jax.random.normal(k1, (B, D), dtype=jnp.float32)
    z2 = jax.random.normal(k2, (B, D), dtype=jnp.float32)

    loss_fn = jax.jit(barlow_twins_loss)
    loss = jax.block_until_ready(loss_fn(z1, z2))
    ref = jax.block_until_ready(_reference(z1, z2))
    # bf16 MXU operands are only in the lambda^2-scaled off-diagonal term; the
    # dominant diagonal term stays f32, so 1e-3 tolerance is comfortably loose.
    assert jnp.allclose(loss, ref, rtol=1e-3, atol=1e-3), (loss, ref)
    print("KERNEL_OK")
</pallas_src>

<mosaic_0001>
module attributes {stable_mosaic.version = 11 : i64} {
  func.func @_xcorr_sumsq_kernel(%arg0: i32, %arg1: i32, %arg2: i32, %arg3: memref<8x32xbf16, #tpu.memory_space<vmem>>, %arg4: memref<8x32xbf16, #tpu.memory_space<vmem>>, %arg5: memref<1x1x1x1xf32, #tpu.memory_space<vmem>>, %arg6: memref<32x32xf32, #tpu.memory_space<vmem>>) attributes {dimension_semantics = [#tpu.dimension_semantics<parallel>, #tpu.dimension_semantics<parallel>, #tpu.dimension_semantics<arbitrary>], iteration_bounds = array<i64: 1, 1, 1>, scalar_prefetch = 0 : i64, scratch_operands = 1 : i64, tpu.core_type = #tpu.core_type<tc>, window_params = [{transform_indices = @transform_0, window_bounds = array<i64: 8, 32>}, {transform_indices = @transform_1, window_bounds = array<i64: 8, 32>}, {transform_indices = @transform_2, window_bounds = array<i64: 1, 1, 1, 1>}]} {
    %c0_i32 = arith.constant 0 : i32
    %0 = arith.cmpi eq, %arg2, %c0_i32 : i32
    %1 = arith.extui %0 : i1 to i32
    %c0_i32_0 = arith.constant 0 : i32
    %2 = arith.cmpi ne, %1, %c0_i32_0 : i32
    scf.if %2 {
      %cst_10 = arith.constant 0.000000e+00 : f32
      %12 = vector.broadcast %cst_10 : f32 to vector<32x32xf32>
      %c0_11 = arith.constant 0 : index
      %c0_12 = arith.constant 0 : index
      %13 = vector.load %arg6[%c0_11, %c0_12] : memref<32x32xf32, #tpu.memory_space<vmem>>, vector<32x32xf32>
      tpu.vector_store %arg6[%c0_11, %c0_12], %12 {strides = array<i32>} : memref<32x32xf32, #tpu.memory_space<vmem>>, vector<32x32xf32>,
    } else {
    }
    %c0 = arith.constant 0 : index
    %c0_1 = arith.constant 0 : index
    %3 = vector.load %arg6[%c0, %c0_1] : memref<32x32xf32, #tpu.memory_space<vmem>>, vector<32x32xf32>
    %c0_2 = arith.constant 0 : index
    %c0_3 = arith.constant 0 : index
    %4 = vector.load %arg3[%c0_2, %c0_3] : memref<8x32xbf16, #tpu.memory_space<vmem>>, vector<8x32xbf16>
    %c0_4 = arith.constant 0 : index
    %c0_5 = arith.constant 0 : index
    %5 = vector.load %arg4[%c0_4, %c0_5] : memref<8x32xbf16, #tpu.memory_space<vmem>>, vector<8x32xbf16>
    %cst = arith.constant dense<0.000000e+00> : vector<32x32xf32>
    %6 = tpu.matmul %4, %5, %cst {dimension_numbers = #tpu.dot_dimension_numbers<[0], [0], [1], [1], [0, 1, 1, 1], [], []>} : vector<8x32xbf16>, vector<8x32xbf16>, vector<32x32xf32> -> vector<32x32xf32>
    %7 = arith.addf %3, %6 : vector<32x32xf32>
    %c0_6 = arith.constant 0 : index
    %c0_7 = arith.constant 0 : index
    %8 = vector.load %arg6[%c0_6, %c0_7] : memref<32x32xf32, #tpu.memory_space<vmem>>, vector<32x32xf32>
    tpu.vector_store %arg6[%c0_6, %c0_7], %7 {strides = array<i32>} : memref<32x32xf32, #tpu.memory_space<vmem>>, vector<32x32xf32>,
    %c0_i32_8 = arith.constant 0 : i32
    %9 = arith.cmpi eq, %arg2, %c0_i32_8 : i32
    %10 = arith.extui %9 : i1 to i32
    %c0_i32_9 = arith.constant 0 : i32
    %11 = arith.cmpi ne, %10, %c0_i32_9 : i32
    scf.if %11 {
      %c0_10 = arith.constant 0 : index
      %c0_11 = arith.constant 0 : index
      %12 = vector.load %arg6[%c0_10, %c0_11] : memref<32x32xf32, #tpu.memory_space<vmem>>, vector<32x32xf32>
      %13 = arith.mulf %12, %12 : vector<32x32xf32>
      %14 = vector.shape_cast %13 : vector<32x32xf32> to vector<1x32x32xf32>
      %cst_12 = arith.constant dense<0.000000e+00> : vector<1xf32>
      %15 = vector.multi_reduction <add>, %14, %cst_12 [1, 2] : vector<1x32x32xf32> to vector<1xf32>
      %16 = vector.shape_cast %15 : vector<1xf32> to vector<1x1x1xf32>
      %17 = vector.extract %16[0, 0, 0] : f32 from vector<1x1x1xf32>
      %18 = vector.broadcast %17 : f32 to vector<1x1xf32>
      %19 = vector.shape_cast %18 : vector<1x1xf32> to vector<1x1x1x1xf32>
      %c0_13 = arith.constant 0 : index
      %c0_14 = arith.constant 0 : index
      %c0_15 = arith.constant 0 : index
      %c0_16 = arith.constant 0 : index
      %20 = vector.load %arg5[%c0_13, %c0_14, %c0_15, %c0_16] : memref<1x1x1x1xf32, #tpu.memory_space<vmem>>, vector<1x1x1x1xf32>
      tpu.vector_store %arg5[%c0_13, %c0_14, %c0_15, %c0_16], %19 {strides = array<i32>} : memref<1x1x1x1xf32, #tpu.memory_space<vmem>>, vector<1x1x1x1xf32>,
    } else {
    }
    return
  }
  func.func @transform_0(%arg0: i32, %arg1: i32, %arg2: i32) -> (i32, i32) {
    %c0_i32 = arith.constant 0 : i32
    return %arg2, %arg0 : i32, i32
  }
  func.func @transform_1(%arg0: i32, %arg1: i32, %arg2: i32) -> (i32, i32) {
    %c0_i32 = arith.constant 0 : i32
    return %arg2, %arg1 : i32, i32
  }
  func.func @transform_2(%arg0: i32, %arg1: i32, %arg2: i32) -> (i32, i32, i32, i32) {
    %c0_i32 = arith.constant 0 : i32
    %c0_i32_0 = arith.constant 0 : i32
    %c0_i32_1 = arith.constant 0 : i32
    return %arg0, %arg1, %c0_i32, %c0_i32_0 : i32, i32, i32, i32
  }
}

module attributes {stable_mosaic.version = 11 : i64} {
  func.func @_normalize_kernel(%arg0: i32, %arg1: memref<8x32xf32, #tpu.memory_space<vmem>>, %arg2: memref<8x32xf32, #tpu.memory_space<vmem>>, %arg3: memref<8x32xbf16, #tpu.memory_space<vmem>>, %arg4: memref<8x32xbf16, #tpu.memory_space<vmem>>, %arg5: memref<1x32xf32, #tpu.memory_space<vmem>>) attributes {dimension_semantics = [#tpu.dimension_semantics<parallel>], iteration_bounds = array<i64: 1>, scalar_prefetch = 0 : i64, scratch_operands = 0 : i64, tpu.core_type = #tpu.core_type<tc>, window_params = [{transform_indices = @transform_0, window_bounds = array<i64: 8, 32>}, {transform_indices = @transform_1, window_bounds = array<i64: 8, 32>}, {transform_indices = @transform_2, window_bounds = array<i64: 8, 32>}, {transform_indices = @transform_3, window_bounds = array<i64: 8, 32>}, {transform_indices = @transform_4, window_bounds = array<i64: 1, 32>}]} {
    %c0 = arith.constant 0 : index
    %c0_0 = arith.constant 0 : index
    %0 = vector.load %arg1[%c0, %c0_0] : memref<8x32xf32, #tpu.memory_space<vmem>>, vector<8x32xf32>
    %c0_1 = arith.constant 0 : index
    %c0_2 = arith.constant 0 : index
    %1 = vector.load %arg2[%c0_1, %c0_2] : memref<8x32xf32, #tpu.memory_space<vmem>>, vector<8x32xf32>
    %cst = arith.constant dense<0.000000e+00> : vector<32xf32>
    %2 = vector.multi_reduction <add>, %0, %cst [0] : vector<8x32xf32> to vector<32xf32>
    %3 = vector.shape_cast %2 : vector<32xf32> to vector<1x32xf32>
    %cst_3 = arith.constant 8.000000e+00 : f32
    %4 = vector.broadcast %cst_3 : f32 to vector<1x32xf32>
    %5 = arith.divf %3, %4 : vector<1x32xf32>
    %6 = vector.broadcast %5 : vector<1x32xf32> to vector<8x32xf32>
    %7 = arith.subf %0, %6 : vector<8x32xf32>
    %cst_4 = arith.constant dense<0.000000e+00> : vector<32xf32>
    %8 = vector.multi_reduction <add>, %1, %cst_4 [0] : vector<8x32xf32> to vector<32xf32>
    %9 = vector.shape_cast %8 : vector<32xf32> to vector<1x32xf32>
    %cst_5 = arith.constant 8.000000e+00 : f32
    %10 = vector.broadcast %cst_5 : f32 to vector<1x32xf32>
    %11 = arith.divf %9, %10 : vector<1x32xf32>
    %12 = vector.broadcast %11 : vector<1x32xf32> to vector<8x32xf32>
    %13 = arith.subf %1, %12 : vector<8x32xf32>
    %14 = arith.mulf %7, %7 : vector<8x32xf32>
    %cst_6 = arith.constant dense<0.000000e+00> : vector<32xf32>
    %15 = vector.multi_reduction <add>, %14, %cst_6 [0] : vector<8x32xf32> to vector<32xf32>
    %16 = vector.shape_cast %15 : vector<32xf32> to vector<1x32xf32>
    %cst_7 = arith.constant 8.000000e+00 : f32
    %17 = vector.broadcast %cst_7 : f32 to vector<1x32xf32>
    %18 = arith.divf %16, %17 : vector<1x32xf32>
    %cst_8 = arith.constant 9.99999997E-7 : f32
    %19 = vector.broadcast %cst_8 : f32 to vector<1x32xf32>
    %20 = arith.addf %18, %19 : vector<1x32xf32>
    %21 = math.rsqrt %20 : vector<1x32xf32>
    %22 = vector.broadcast %21 : vector<1x32xf32> to vector<8x32xf32>
    %23 = arith.mulf %7, %22 : vector<8x32xf32>
    %24 = arith.mulf %13, %13 : vector<8x32xf32>
    %cst_9 = arith.constant dense<0.000000e+00> : vector<32xf32>
    %25 = vector.multi_reduction <add>, %24, %cst_9 [0] : vector<8x32xf32> to vector<32xf32>
    %26 = vector.shape_cast %25 : vector<32xf32> to vector<1x32xf32>
    %cst_10 = arith.constant 8.000000e+00 : f32
    %27 = vector.broadcast %cst_10 : f32 to vector<1x32xf32>
    %28 = arith.divf %26, %27 : vector<1x32xf32>
    %cst_11 = arith.constant 9.99999997E-7 : f32
    %29 = vector.broadcast %cst_11 : f32 to vector<1x32xf32>
    %30 = arith.addf %28, %29 : vector<1x32xf32>
    %31 = math.rsqrt %30 : vector<1x32xf32>
    %32 = vector.broadcast %31 : vector<1x32xf32> to vector<8x32xf32>
    %33 = arith.mulf %13, %32 : vector<8x32xf32>
    %34 = arith.mulf %23, %33 : vector<8x32xf32>
    %cst_12 = arith.constant dense<0.000000e+00> : vector<32xf32>
    %35 = vector.multi_reduction <add>, %34, %cst_12 [0] : vector<8x32xf32> to vector<32xf32>
    %36 = vector.shape_cast %35 : vector<32xf32> to vector<1x32xf32>
    %cst_13 = arith.constant 1.250000e-01 : f32
    %37 = vector.broadcast %cst_13 : f32 to vector<1x32xf32>
    %38 = arith.mulf %36, %37 : vector<1x32xf32>
    %c0_14 = arith.constant 0 : index
    %c0_15 = arith.constant 0 : index
    %39 = vector.load %arg5[%c0_14, %c0_15] : memref<1x32xf32, #tpu.memory_space<vmem>>, vector<1x32xf32>
    tpu.vector_store %arg5[%c0_14, %c0_15], %38 {strides = array<i32>} : memref<1x32xf32, #tpu.memory_space<vmem>>, vector<1x32xf32>,
    %cst_16 = arith.constant 0.353553385 : f32
    %40 = vector.broadcast %cst_16 : f32 to vector<8x32xf32>
    %41 = arith.mulf %23, %40 : vector<8x32xf32>
    %42 = arith.truncf %41 : vector<8x32xf32> to vector<8x32xbf16>
    %c0_17 = arith.constant 0 : index
    %c0_18 = arith.constant 0 : index
    %43 = vector.load %arg3[%c0_17, %c0_18] : memref<8x32xbf16, #tpu.memory_space<vmem>>, vector<8x32xbf16>
    tpu.vector_store %arg3[%c0_17, %c0_18], %42 {strides = array<i32>} : memref<8x32xbf16, #tpu.memory_space<vmem>>, vector<8x32xbf16>,
    %cst_19 = arith.constant 0.353553385 : f32
    %44 = vector.broadcast %cst_19 : f32 to vector<8x32xf32>
    %45 = arith.mulf %33, %44 : vector<8x32xf32>
    %46 = arith.truncf %45 : vector<8x32xf32> to vector<8x32xbf16>
    %c0_20 = arith.constant 0 : index
    %c0_21 = arith.constant 0 : index
    %47 = vector.load %arg4[%c0_20, %c0_21] : memref<8x32xbf16, #tpu.memory_space<vmem>>, vector<8x32xbf16>
    tpu.vector_store %arg4[%c0_20, %c0_21], %46 {strides = array<i32>} : memref<8x32xbf16, #tpu.memory_space<vmem>>, vector<8x32xbf16>,
    return
  }
  func.func @transform_0(%arg0: i32) -> (i32, i32) {
    %c0_i32 = arith.constant 0 : i32
    %c0_i32_0 = arith.constant 0 : i32
    return %c0_i32, %arg0 : i32, i32
  }
  func.func @transform_1(%arg0: i32) -> (i32, i32) {
    %c0_i32 = arith.constant 0 : i32
    %c0_i32_0 = arith.constant 0 : i32
    return %c0_i32, %arg0 : i32, i32
  }
  func.func @transform_2(%arg0: i32) -> (i32, i32) {
    %c0_i32 = arith.constant 0 : i32
    %c0_i32_0 = arith.constant 0 : i32
    return %c0_i32, %arg0 : i32, i32
  }
  func.func @transform_3(%arg0: i32) -> (i32, i32) {
    %c0_i32 = arith.constant 0 : i32
    %c0_i32_0 = arith.constant 0 : i32
    return %c0_i32, %arg0 : i32, i32
  }
  func.func @transform_4(%arg0: i32) -> (i32, i32) {
    %c0_i32 = arith.constant 0 : i32
    %c0_i32_0 = arith.constant 0 : i32
    return %c0_i32, %arg0 : i32, i32
  }
}

</mosaic_0001>

<bundles_post_ra>
// kernel: barlow_twins_loss.3
= control target key start
LH: loop header
LB: loop body
LE: loop exit
PB: predicated region body
PF: predicated region fallthrough
CT: control target
= control target key end

     0   :  { %vm51_vm0 = vcmask 1043456   ;;  %s201_s0 = inlined_call_operand.vmem [shape: bf16[8,32], index: 0, kind: input, shape index: {}]   ;;  %s202_s1 = inlined_call_operand.vmem [shape: bf16[8,32], index: 1, kind: input, shape index: {}]   ;;  %s203_s2 = inlined_call_operand.hbm [shape: f32[1,1,1,1], index: 2, kind: output, shape index: {}]  }
   0x1   :  { %v26_v0 = vld [vmem:[%s201_s0] sm:$0xf] }
   0x2   :  { %v27_v1 = vld [vmem:[%s202_s1] sm:$0xf]  ;;  %28 = vxpose.xlu0.c.b16.start.end [1/1] (short) (narrow) %v26_v0, 32 }
   0x3   :  { %v53_v2 = vsel %vm51_vm0, %v27_v1, 0 }
   0x4   :  { %7 = vsyncpa [#allocation4], 0  ;;  %62 = vmatpush.bf16.msra.mxu0 %v53_v2  ;;  %131 = vmatpush.bf16.msra.mxu1 %v53_v2  ;;  %vm17_vm1 = vcmask 261120   ;;  %v163_v3 = vmov 0.0   ;;  %vm44_vm2 = vcmask 64512   ;;  %s164_s0 = smov [#allocation3]  }
   0x5   :  { %18 = vst.msk [vmem:[#allocation2] sm:$0xff] %vm17_vm1, %v163_v3  ;;  %s118_s1 = sshll.u32 %s164_s0, 4  ;;  %s120_s15 = sshll.u32 %s203_s2, 4  ;;  %vm111_vm3 = vcmask 0   ;;  %s119_s1 = int_to_ptr.vmem [resolvable:$true] %s118_s1  ;;  %s121_s15 = int_to_ptr.hbm [resolvable:$true] %s120_s15 }
   0x6   :  { %19 = vst.msk [vmem:[#allocation2 + $0x8] sm:$0xff] %vm17_vm1, %v163_v3 }
   0x7   :  { %20 = vst.msk [vmem:[#allocation2 + $0x10] sm:$0xff] %vm17_vm1, %v163_v3 }
   0x8   :  { %21 = vst.msk [vmem:[#allocation2 + $0x18] sm:$0xff] %vm17_vm1, %v163_v3 }
   0xc   :  { %v22_v6 = vld [vmem:[#allocation2] sm:$0xff] }
   0xd   :  { %v23_v9 = vld [vmem:[#allocation2 + $0x8] sm:$0xff] }
   0xe   :  { %v24_v12 = vld [vmem:[#allocation2 + $0x10] sm:$0xff] }
   0xf   :  { %v25_v15 = vld [vmem:[#allocation2 + $0x18] sm:$0xff] }
  0xae   :  { %v36_v4 = vpop.trf.xlu0 }
  0xaf   :  { %129 = vmatmul.msk.bf16.vlgmr.msra.gmra.mxu0 %vm44_vm2, %v36_v4 }
  0xbe   :  { %v37_v5 = vpop.trf.xlu0 }
  0xbf   :  { %130 = vmatmul.msk.bf16.vlgmr.msra.gmra.mxu1 %vm44_vm2, %v37_v5 }
 0x12c   :  { %v64_v7 = vpop.f32.mrf.mxu0 }
 0x12d   :  { %v74_v8 = vadd.f32 %v64_v7, %v22_v6 }
 0x12f   :  { %79 = vst.msk [vmem:[#allocation2] sm:$0xff] %vm17_vm1, %v74_v8 }
 0x134   :  { %v66_v10 = vpop.f32.mrf.mxu0 }
 0x135   :  { %v75_v11 = vadd.f32 %v66_v10, %v23_v9 }
 0x136   :  { %v86_v17 = vld [vmem:[#allocation2] sm:$0xff] }
 0x137   :  { %80 = vst.msk [vmem:[#allocation2 + $0x8] sm:$0xff] %vm17_vm1, %v75_v11  ;;  %v90_v21 = vmul.f32 %v86_v17, %v86_v17 }
 0x139   :  { %v94_v24 = vsel %vm17_vm1, %v90_v21, 0.0 }
 0x13c   :  { %v69_v13 = vpop.f32.mrf.mxu1 }
 0x13d   :  { %v76_v14 = vadd.f32 %v69_v13, %v24_v12 }
 0x13e   :  { %v87_v18 = vld [vmem:[#allocation2 + $0x8] sm:$0xff] }
 0x13f   :  { %81 = vst.msk [vmem:[#allocation2 + $0x10] sm:$0xff] %vm17_vm1, %v76_v14  ;;  %v91_v22 = vmul.f32 %v87_v18, %v87_v18 }
 0x141   :  { %v95_v25 = vsel %vm17_vm1, %v91_v22, 0.0 }
 0x142   :  { %v96_v28 = vadd.f32 %v95_v25, %v94_v24 }
 0x144   :  { %v71_v16 = vpop.f32.mrf.mxu1 }
 0x145   :  { %v77_v19 = vadd.f32 %v71_v16, %v25_v15 }
 0x146   :  { %v88_v20 = vld [vmem:[#allocation2 + $0x10] sm:$0xff] }
 0x147   :  { %82 = vst.msk [vmem:[#allocation2 + $0x18] sm:$0xff] %vm17_vm1, %v77_v19  ;;  %v92_v23 = vmul.f32 %v88_v20, %v88_v20 }
 0x149   :  { %v97_v26 = vsel %vm17_vm1, %v92_v23, 0.0 }
 0x14a   :  { %v98_v30 = vadd.f32 %v97_v26, %v96_v28 }
 0x14e   :  { %v89_v27 = vld [vmem:[#allocation2 + $0x18] sm:$0xff] }
 0x14f   :  { %v93_v29 = vmul.f32 %v89_v27, %v89_v27 }
 0x151   :  { %v99_v31 = vsel %vm17_vm1, %v93_v29, 0.0 }
 0x152   :  { %v100_v32 = vadd.f32 %v99_v31, %v98_v30 }
 0x154   :  { %101 = vadd.xlane.f32.xlu0 %v100_v32 }
 0x1c7   :  { %v102_v33 = vpop.xlane.xlu0 %101 }
 0x1c8   :  { %v103_v34 = vrot.slane %v102_v33, 4 }
 0x1ca   :  { %v104_v35 = vadd.f32 %v103_v34, %v102_v33 }
 0x1cc   :  { %v105_v36 = vrot.slane %v104_v35, 2 }
 0x1ce   :  { %v106_v37 = vadd.f32 %v105_v36, %v104_v35 }
 0x1d0   :  { %v107_v38 = vrot.slane %v106_v37, 1 }
 0x1d2   :  { %v108_v39 = vadd.f32 %v107_v38, %v106_v37 }
 0x1d4   :  { %132 = vpush %v108_v39 }
 0x205   :  { %s133_s16 = spop %132 }
 0x206   :  { %v110_v40 = vstv %s133_s16 }
 0x207   :  { %112 = vst.msk [vmem:[#allocation3] sm:$0x1] %vm111_vm3, %v110_v40 }
 0x208   :  { %123 = dma.vmem_to_hbm [thread:$0]  %s119_s1, 16, %s121_s15, [#allocation4]  }
 0x209   :  { %161 = dma.done.wait [#allocation4], 16  }
 0x20a   :  { %162 = vsyncadd [#allocation4], 4294967280 }
 0x20b   :  { %128 = vsyncpa [#allocation4], 1 }

// kernel: barlow_twins_loss.2
= control target key start
LH: loop header
LB: loop body
LE: loop exit
PB: predicated region body
PF: predicated region fallthrough
CT: control target
= control target key end

     0   :  { %10 = vsyncpa [#allocation3], 0  ;;  %s253_s0 = inlined_call_operand.hbm [shape: f32[8,32], index: 0, kind: input, shape index: {}]   ;;  %s254_s1 = inlined_call_operand.hbm [shape: f32[8,32], index: 1, kind: input, shape index: {}]   ;;  %s255_s2 = inlined_call_operand.vmem [shape: bf16[8,32], index: 2, kind: output, shape index: {0}]   ;;  %s256_s3 = inlined_call_operand.vmem [shape: bf16[8,32], index: 3, kind: output, shape index: {1}]   ;;  %s257_s4 = inlined_call_operand.vmem [shape: f32[1,32], index: 4, kind: output, shape index: {2}]  }
   0x1   :  { %s17_s17 = sshll.u32 %s253_s0, 4  ;;  %s18_s17 = int_to_ptr.hbm [resolvable:$true] %s17_s17 }
   0x2   :  { %11 = vsyncpa [#allocation5], 0  ;;  %s205_s18 = smov [#allocation2]   ;;  %s28_s22 = sshll.u32 %s254_s1, 4  ;;  %s29_s22 = int_to_ptr.hbm [resolvable:$true] %s28_s22 }
   0x3   :  { %s19_s19 = sshll.u32 %s205_s18, 4  ;;  %s206_s23 = smov [#allocation4]   ;;  %s20_s19 = int_to_ptr.vmem [resolvable:$true] %s19_s19 }
   0x4   :  { %22 = dma.hbm_to_vmem [thread:$0]  %s18_s17, 128, %s20_s19, [#allocation3]  }
   0x5   :  { %s30_s24 = sshll.u32 %s206_s23, 4  ;;  %s31_s24 = int_to_ptr.vmem [resolvable:$true] %s30_s24 }
   0x6   :  { %33 = dma.hbm_to_vmem [thread:$0]  %s29_s22, 128, %s31_s24, [#allocation5]  }
   0x7   :  { %201 = dma.done.wait [#allocation3], 128  }
   0x8   :  { %202 = vsyncadd [#allocation3], 4294967168 }
   0x9   :  { %203 = dma.done.wait [#allocation5], 128  }
   0xa   :  { %204 = vsyncadd [#allocation5], 4294967168  ;;  %v207_v0 = vmov 8.0   ;;  %vm44_vm0 = vcmask 261120   ;;  %v42_v2 = vld [vmem:[#allocation2] sm:$0xff]  ;;  %v43_v3 = vld [vmem:[#allocation4] sm:$0xff] }
   0xb   :  { %147 = vrcp.f32 %v207_v0  ;;  %v45_v4 = vsel %vm44_vm0, %v42_v2, 0.0  ;;  %v61_v6 = vsel %vm44_vm0, %v43_v3, 0.0  ;;  %vm125_vm8 = vcmask 257024  }
   0xc   :  { %v46_v7 = vrot.slane %v45_v4, 4  ;;  %v62_v8 = vrot.slane %v61_v6, 4  ;;  %vm121_vm9 = vcmask 253952  }
   0xe   :  { %v47_v10 = vadd.f32 %v46_v7, %v45_v4  ;;  %v63_v11 = vadd.f32 %v62_v8, %v61_v6 }
  0x10   :  { %v48_v13 = vrot.slane %v47_v10, 2  ;;  %v64_v14 = vrot.slane %v63_v11, 2 }
  0x11   :  { %v148_v1 = vpop.eup %147 }
  0x12   :  { %v53_v5 = vmul.f32 8.0, %v148_v1  ;;  %v49_v16 = vadd.f32 %v48_v13, %v47_v10  ;;  %vm57_vm1 = vweird.f32 %v148_v1  ;;  %v65_v17 = vadd.f32 %v64_v14, %v63_v11 }
  0x14   :  { %v54_v9 = vsub.f32 1.0, %v53_v5  ;;  %v50_v18 = vrot.slane %v49_v16, 1  ;;  %v66_v19 = vrot.slane %v65_v17, 1 }
  0x16   :  { %v55_v12 = vmul.f32 %v148_v1, %v54_v9  ;;  %v51_v21 = vadd.f32 %v50_v18, %v49_v16  ;;  %v67_v22 = vadd.f32 %v66_v19, %v65_v17 }
  0x18   :  { %v56_v15 = vadd.f32 %v148_v1, %v55_v12 }
  0x1a   :  { %v58_v20 = vsel %vm57_vm1, %v148_v1, %v56_v15 }
  0x1b   :  { %v59_v23 = vmul.f32 %v58_v20, %v51_v21  ;;  %v68_v24 = vmul.f32 %v67_v22, %v58_v20 }
  0x1d   :  { %v60_v25 = vsub.f32 %v42_v2, %v59_v23  ;;  %v69_v26 = vsub.f32 %v43_v3, %v68_v24 }
  0x1f   :  { %v70_v27 = vmul.f32 %v60_v25, %v60_v25  ;;  %v91_v28 = vmul.f32 %v69_v26, %v69_v26 }
  0x21   :  { %v71_v29 = vsel %vm44_vm0, %v70_v27, 0.0  ;;  %v92_v30 = vsel %vm44_vm0, %v91_v28, 0.0 }
  0x22   :  { %v72_v31 = vrot.slane %v71_v29, 4  ;;  %v93_v32 = vrot.slane %v92_v30, 4 }
  0x24   :  { %v73_v33 = vadd.f32 %v72_v31, %v71_v29  ;;  %v94_v34 = vadd.f32 %v93_v32, %v92_v30 }
  0x26   :  { %v74_v35 = vrot.slane %v73_v33, 2  ;;  %v95_v36 = vrot.slane %v94_v34, 2 }
  0x28   :  { %v75_v37 = vadd.f32 %v74_v35, %v73_v33  ;;  %v96_v38 = vadd.f32 %v95_v36, %v94_v34 }
  0x2a   :  { %v76_v39 = vrot.slane %v75_v37, 1  ;;  %v97_v40 = vrot.slane %v96_v38, 1 }
  0x2c   :  { %v77_v41 = vadd.f32 %v76_v39, %v75_v37  ;;  %v98_v42 = vadd.f32 %v97_v40, %v96_v38 }
  0x2e   :  { %v78_v43 = vmul.f32 %v77_v41, %v58_v20  ;;  %v99_v44 = vmul.f32 %v98_v42, %v58_v20 }
  0x30   :  { %v79_v45 = vadd.f32 1e-06, %v78_v43  ;;  %v100_v46 = vadd.f32 1e-06, %v99_v44 }
  0x32   :  { %149 = vrsqrt.f32 %v79_v45  ;;  %vm86_vm2 = vweird.f32 %v79_v45  ;;  %vm107_vm4 = vweird.f32 %v100_v46 }
  0x33   :  { %151 = vrsqrt.f32 %v100_v46 }
  0x38   :  { %v150_v47 = vpop.eup %149 }
  0x39   :  { %v152_v48 = vpop.eup %151  ;;  %v81_v49 = vmul.f32 %v150_v47, %v79_v45  ;;  %vm87_vm3 = vweird.f32 %v150_v47 }
  0x3a   :  { %v102_v50 = vmul.f32 %v152_v48, %v100_v46  ;;  %vm108_vm5 = vweird.f32 %v152_v48  ;;  %vm88_vm6 = vmor %vm86_vm2, %vm87_vm3 }
  0x3b   :  { %v82_v51 = vmul.f32 %v150_v47, %v81_v49  ;;  %vm109_vm7 = vmor %vm107_vm4, %vm108_vm5 }
  0x3c   :  { %v103_v52 = vmul.f32 %v152_v48, %v102_v50 }
  0x3d   :  { %v83_v53 = vmul.f32 0.5, %v82_v51 }
  0x3e   :  { %v104_v54 = vmul.f32 0.5, %v103_v52 }
  0x3f   :  { %v84_v55 = vsub.f32 1.5, %v83_v53 }
  0x40   :  { %v105_v56 = vsub.f32 1.5, %v104_v54 }
  0x41   :  { %v85_v57 = vmul.f32 %v150_v47, %v84_v55 }
  0x42   :  { %v106_v58 = vmul.f32 %v152_v48, %v105_v56 }
  0x43   :  { %v89_v59 = vsel %vm88_vm6, %v150_v47, %v85_v57 }
  0x44   :  { %v90_v60 = vmul.f32 %v89_v59, %v60_v25  ;;  %v110_v61 = vsel %vm109_vm7, %v152_v48, %v106_v58 }
  0x45   :  { %v111_v62 = vmul.f32 %v110_v61, %v69_v26 }
  0x46   :  { %v123_v63 = vmul.f32 0.35355338, %v90_v60 }
  0x47   :  { %v112_v0 = vmul.f32 %v111_v62, %v90_v60  ;;  %v127_v1 = vmul.f32 0.35355338, %v111_v62 }
  0x48   :  { %v124_v2 = vpack.c.bf16 %v123_v63, %v123_v63 }
  0x49   :  { %v113_v3 = vsel %vm44_vm0, %v112_v0, 0.0  ;;  %v128_v4 = vpack.c.bf16 %v127_v1, %v127_v1 }
  0x4a   :  { %v114_v5 = vrot.slane %v113_v3, 4  ;;  %126 = vst.msk [vmem:[%s255_s2] sm:$0xf] %vm125_vm8, %v124_v2 }
  0x4b   :  { %129 = vst.msk [vmem:[%s256_s3] sm:$0xf] %vm125_vm8, %v128_v4 }
  0x4c   :  { %v115_v6 = vadd.f32 %v114_v5, %v113_v3 }
  0x4e   :  { %v116_v7 = vrot.slane %v115_v6, 2 }
  0x50   :  { %v117_v8 = vadd.f32 %v116_v7, %v115_v6 }
  0x52   :  { %v118_v9 = vrot.slane %v117_v8, 1 }
  0x54   :  { %v119_v10 = vadd.f32 %v118_v9, %v117_v8 }
  0x56   :  { %v120_v11 = vmul.f32 0.125, %v119_v10 }
  0x58   :  { %122 = vst.msk [vmem:[%s257_s4] sm:$0x1] %vm121_vm9, %v120_v11 }
  0x59   :  { %142 = vsyncpa [#allocation3], 1 }
  0x5a   :  { %143 = vsyncpa [#allocation5], 1 }

</bundles_post_ra>
